<compile_context>
chip_gen: v5e
topology: v5e:2x2
jax: 0.10.0
libtpu: 0.0.40
codegen_flags: <defaults>
</compile_context>

<pallas_src>
import functools
import math

import jax
import jax.numpy as jnp
from jax import lax
from jax.experimental import pallas as pl
from jax.experimental.pallas import tpu as pltpu


DEFAULT_MASK_VALUE = -0.7 * float(jnp.finfo(jnp.float32).max)


def _pick_tile(n, pref, align):
    """Largest multiple of `align` that divides n and is <= pref; else full dim."""
    if n <= pref:
        return n
    t = (pref // align) * align
    while t >= align:
        if n % t == 0:
            return t
        t -= align
    return n


# ----------------------------- tiled linear (fused QKV + generic) -----------------------------

def _linear_kernel(x_ref, w_ref, b_ref, o_ref, acc_ref):
    k = pl.program_id(2)

    @pl.when(k == 0)
    def _():
        acc_ref[...] = jnp.zeros_like(acc_ref)

    acc_ref[...] += jnp.dot(x_ref[...], w_ref[...],
                            preferred_element_type=jnp.float32)

    @pl.when(k == pl.num_programs(2) - 1)
    def _():
        o_ref[...] = (acc_ref[...] + b_ref[...].astype(jnp.float32)).astype(o_ref.dtype)


def linear(x2d, w_t, bias, *, tm_pref=256, tn_pref=256, tk_pref=512):
    """x2d: (M, K), w_t: (K, N), bias: (N,) -> (M, N). Tiled + pipelined."""
    M, K = x2d.shape
    N = w_t.shape[1]
    tm = _pick_tile(M, tm_pref, 8)
    tn = _pick_tile(N, tn_pref, 128)
    tk = _pick_tile(K, tk_pref, 128)
    grid = (M // tm, N // tn, K // tk)
    cost = pl.CostEstimate(flops=2 * M * N * K, transcendentals=0,
                           bytes_accessed=4 * (M * K + K * N + M * N + N))
    return pl.pallas_call(
        _linear_kernel,
        out_shape=jax.ShapeDtypeStruct((M, N), x2d.dtype),
        grid_spec=pltpu.PrefetchScalarGridSpec(
            num_scalar_prefetch=0,
            grid=grid,
            in_specs=[
                pl.BlockSpec((tm, tk), lambda i, j, k: (i, k)),
                pl.BlockSpec((tk, tn), lambda i, j, k: (k, j)),
                pl.BlockSpec((1, tn), lambda i, j, k: (0, j)),
            ],
            out_specs=pl.BlockSpec((tm, tn), lambda i, j, k: (i, j)),
            scratch_shapes=[pltpu.VMEM((tm, tn), jnp.float32)],
        ),
        compiler_params=pltpu.CompilerParams(
            dimension_semantics=("parallel", "parallel", "arbitrary"),
            vmem_limit_bytes=48 * 1024 * 1024,
        ),
        cost_estimate=cost,
    )(x2d, w_t, bias.reshape(1, N))


# ------------------- Wo projection reading the (B, H, S, hd) layout directly -------------------

def _linear_heads_kernel(x_ref, w_ref, b_ref, o_ref, acc_ref):
    h = pl.program_id(3)

    @pl.when(h == 0)
    def _():
        acc_ref[...] = jnp.zeros_like(acc_ref)

    # x block: (1, 1, tm, hd); w block: (1, hd, tn)
    acc_ref[...] += jnp.dot(x_ref[0, 0], w_ref[0],
                            preferred_element_type=jnp.float32)

    @pl.when(h == pl.num_programs(3) - 1)
    def _():
        o_ref[0] = (acc_ref[...] + b_ref[...].astype(jnp.float32)).astype(o_ref.dtype)


def linear_from_heads(x_bhsd, w_hdn, bias, *, tm_pref=256, tn_pref=256):
    """x: (B, H, S, hd), w: (H, hd, N), bias: (N,) -> (B, S, N).

    Contracts over (H, hd) directly so no (B,H,S,hd)->(B,S,H*hd) transpose is needed.
    """
    B, H, S, hd = x_bhsd.shape
    N = w_hdn.shape[-1]
    tm = _pick_tile(S, tm_pref, 8)
    tn = _pick_tile(N, tn_pref, 128)
    grid = (B, S // tm, N // tn, H)
    cost = pl.CostEstimate(flops=2 * B * S * H * hd * N, transcendentals=0,
                           bytes_accessed=4 * (B * H * S * hd + H * hd * N + B * S * N + N))
    return pl.pallas_call(
        _linear_heads_kernel,
        out_shape=jax.ShapeDtypeStruct((B, S, N), x_bhsd.dtype),
        grid_spec=pltpu.PrefetchScalarGridSpec(
            num_scalar_prefetch=0,
            grid=grid,
            in_specs=[
                pl.BlockSpec((1, 1, tm, hd), lambda b, i, j, h: (b, h, i, 0)),
                pl.BlockSpec((1, hd, tn), lambda b, i, j, h: (h, 0, j)),
                pl.BlockSpec((1, tn), lambda b, i, j, h: (0, j)),
            ],
            out_specs=pl.BlockSpec((1, tm, tn), lambda b, i, j, h: (b, i, j)),
            scratch_shapes=[pltpu.VMEM((tm, tn), jnp.float32)],
        ),
        compiler_params=pltpu.CompilerParams(
            dimension_semantics=("parallel", "parallel", "parallel", "arbitrary"),
            vmem_limit_bytes=48 * 1024 * 1024,
        ),
        cost_estimate=cost,
    )(x_bhsd, w_hdn, bias.reshape(1, N))


# ----------------------------- flash attention (causal, GQA) -----------------------------

def _flash_kernel(q_ref, k_ref, v_ref, o_ref, m_ref, l_ref, acc_ref, *,
                  scale, tq, tk, n_rep):
    qi = pl.program_id(2)
    ki = pl.program_id(3)
    hd = q_ref.shape[-1]
    G = n_rep * tq  # grouped query rows (n_rep heads sharing this kv head)

    @pl.when(ki == 0)
    def _init():
        m_ref[...] = jnp.full_like(m_ref, DEFAULT_MASK_VALUE)
        l_ref[...] = jnp.zeros_like(l_ref)
        acc_ref[...] = jnp.zeros_like(acc_ref)

    # Skip kv tiles that are entirely above the causal diagonal (fully masked).
    @pl.when(ki * tk <= qi * tq + (tq - 1))
    def _compute():
        q = q_ref[0].reshape(G, hd) * scale           # pre-scale q (cheaper than scaling SxS)
        k = k_ref[0, 0]                               # (tk, hd)
        v = v_ref[0, 0]                               # (tk, hd)

        # q @ k^T without an explicit transpose of k.
        s = lax.dot_general(q, k, (((1,), (1,)), ((), ())),
                            preferred_element_type=jnp.float32)  # (G, tk)

        # Causal mask: query position vs key position (q row r*tq+i is position qi*tq+i).
        q_pos = qi * tq + lax.broadcasted_iota(
            jnp.int32, (n_rep, tq, tk), 1).reshape(G, tk)
        k_pos = ki * tk + lax.broadcasted_iota(jnp.int32, (G, tk), 1)
        s = jnp.where(k_pos <= q_pos, s, DEFAULT_MASK_VALUE)

        m_prev = m_ref[...]
        m_new = jnp.maximum(m_prev, jnp.max(s, axis=-1, keepdims=True))
        alpha = jnp.exp(m_prev - m_new)
        p = jnp.exp(s - m_new)
        l_ref[...] = alpha * l_ref[...] + jnp.sum(p, axis=-1, keepdims=True)
        acc_ref[...] = alpha * acc_ref[...] + lax.dot_general(
            p.astype(v.dtype), v, (((1,), (0,)), ((), ())),
            preferred_element_type=jnp.float32)
        m_ref[...] = m_new

    @pl.when(ki == pl.num_programs(3) - 1)
    def _finalize():
        # Normalize the accumulator once at the end (EUP reciprocal, not a VALU
        # divide on the score matrix). approx=True would be even cheaper.
        inv_l = pl.reciprocal(l_ref[...], approx=False)
        out = (acc_ref[...] * inv_l).reshape(n_rep, tq, hd)
        o_ref[0] = out.astype(o_ref.dtype)


def flash_attention(q, k, v, n_rep, *, tq_pref=128, tk_pref=128):
    """q: (B, H, S, hd); k, v: (B, Hkv, S, hd) -> (B, H, S, hd). Causal."""
    B, H, S, hd = q.shape
    Hkv = k.shape[1]
    assert H == Hkv * n_rep
    scale = 1.0 / math.sqrt(hd)
    tq = _pick_tile(S, tq_pref, 8)
    tk = _pick_tile(S, tk_pref, 8)
    num_q, num_kv = S // tq, S // tk
    G = n_rep * tq

    kernel = functools.partial(_flash_kernel, scale=scale, tq=tq, tk=tk, n_rep=n_rep)

    def q_map(b, g, qi, ki):
        return (b, g, qi, 0)

    def kv_map(b, g, qi, ki):
        # Clamp to the last kv tile actually needed by this q tile: skipped tiles
        # repeat the previous block index, so no extra DMA is issued for them.
        last_needed = (qi * tq + tq - 1) // tk
        return (b, g, jnp.minimum(ki, last_needed), 0)

    cost = pl.CostEstimate(
        flops=2 * B * H * S * S * hd,              # ~half of dense (causal skip)
        transcendentals=B * H * S * S // 2,
        bytes_accessed=4 * (2 * B * H * S * hd + 2 * B * Hkv * S * hd))

    return pl.pallas_call(
        kernel,
        out_shape=jax.ShapeDtypeStruct((B, H, S, hd), q.dtype),
        grid_spec=pltpu.PrefetchScalarGridSpec(
            num_scalar_prefetch=0,
            grid=(B, Hkv, num_q, num_kv),
            in_specs=[
                pl.BlockSpec((1, n_rep, tq, hd), q_map),   # the n_rep heads sharing kv head g
                pl.BlockSpec((1, 1, tk, hd), kv_map),
                pl.BlockSpec((1, 1, tk, hd), kv_map),
            ],
            out_specs=pl.BlockSpec((1, n_rep, tq, hd), q_map),
            scratch_shapes=[
                pltpu.VMEM((G, 1), jnp.float32),    # running max
                pltpu.VMEM((G, 1), jnp.float32),    # running denom
                pltpu.VMEM((G, hd), jnp.float32),   # output accumulator
            ],
        ),
        compiler_params=pltpu.CompilerParams(
            dimension_semantics=("parallel", "parallel", "parallel", "arbitrary"),
            vmem_limit_bytes=48 * 1024 * 1024,
        ),
        cost_estimate=cost,
    )(q, k, v)


# ----------------------------- module wrapper -----------------------------

def attention_forward(x, params, n_heads, n_kv_heads, compute_dtype=None):
    """x: (bs, seq, dim). Returns (bs, seq, dim).

    compute_dtype: optionally run the matmuls in bf16 (f32 accumulation is kept
    inside the kernels). Default None keeps the input dtype (f32 here).
    """
    bs, seqlen, dim = x.shape
    head_dim = dim // n_heads
    n_rep = n_heads // n_kv_heads

    x2d = x.reshape(bs * seqlen, dim)

    # Fused QKV projection: one pass over x instead of three.
    w_qkv = jnp.concatenate([params["wq"], params["wk"], params["wv"]], axis=0).T
    b_qkv = jnp.concatenate([params["bq"], params["bk"], params["bv"]], axis=0)
    wo3 = params["wo"].T.reshape(n_heads, head_dim, dim)

    if compute_dtype is not None:
        x2d = x2d.astype(compute_dtype)
        w_qkv = w_qkv.astype(compute_dtype)
        wo3 = wo3.astype(compute_dtype)

    qkv = linear(x2d, w_qkv, b_qkv)                  # (bs*seq, (H + 2*Hkv)*hd)
    nq = n_heads * head_dim
    nkv = n_kv_heads * head_dim
    xq = qkv[:, :nq]
    xk = qkv[:, nq:nq + nkv]
    xv = qkv[:, nq + nkv:]

    q = xq.reshape(bs, seqlen, n_heads, head_dim).transpose(0, 2, 1, 3)
    k = xk.reshape(bs, seqlen, n_kv_heads, head_dim).transpose(0, 2, 1, 3)
    v = xv.reshape(bs, seqlen, n_kv_heads, head_dim).transpose(0, 2, 1, 3)

    o = flash_attention(q, k, v, n_rep)              # (bs, n_heads, seq, hd)

    # Wo contracts over (head, head_dim) of o's native layout: no output transpose.
    out = linear_from_heads(o, wo3, params["bo"])    # (bs, seq, dim)
    return out.astype(x.dtype)


# pure-JAX reference for verification
def attention_reference(x, params, n_heads, n_kv_heads):
    bs, seqlen, dim = x.shape
    head_dim = dim // n_heads
    n_rep = n_heads // n_kv_heads

    xq = x @ params["wq"].T + params["bq"]
    xk = x @ params["wk"].T + params["bk"]
    xv = x @ params["wv"].T + params["bv"]

    q = xq.reshape(bs, seqlen, n_heads, head_dim)
    k = xk.reshape(bs, seqlen, n_kv_heads, head_dim)
    v = xv.reshape(bs, seqlen, n_kv_heads, head_dim)
    k = jnp.repeat(k, n_rep, axis=2)
    v = jnp.repeat(v, n_rep, axis=2)

    q = q.transpose(0, 2, 1, 3)
    k = k.transpose(0, 2, 1, 3)
    v = v.transpose(0, 2, 1, 3)

    s = jnp.einsum("bhqd,bhkd->bhqk", q, k) / math.sqrt(head_dim)
    mask = jnp.tril(jnp.ones((seqlen, seqlen), dtype=bool))
    s = jnp.where(mask[None, None], s, -jnp.inf)
    p = jax.nn.softmax(s, axis=-1)
    o = jnp.einsum("bhqk,bhkd->bhqd", p, v)
    o = o.transpose(0, 2, 1, 3).reshape(bs, seqlen, n_heads * head_dim)
    return o @ params["wo"].T + params["bo"]


if __name__ == "__main__":
    # Small config consistent with the module: dim divisible by n_heads,
    # n_heads divisible by n_kv_heads (GQA path with n_rep=2).
    bs, seqlen, dim = 2, 8, 64
    n_heads, n_kv_heads = 4, 2
    head_dim = dim // n_heads

    key = jax.random.PRNGKey(0)
    ks = jax.random.split(key, 9)
    init = lambda k, shape, std: (std * jax.random.normal(k, shape)).astype(jnp.float32)

    params = {
        "wq": init(ks[0], (n_heads * head_dim, dim), 0.02),
        "bq": init(ks[1], (n_heads * head_dim,), 0.02),
        "wk": init(ks[2], (n_kv_heads * head_dim, dim), 0.02),
        "bk": init(ks[3], (n_kv_heads * head_dim,), 0.02),
        "wv": init(ks[4], (n_kv_heads * head_dim, dim), 0.02),
        "bv": init(ks[5], (n_kv_heads * head_dim,), 0.02),
        "wo": init(ks[6], (dim, n_heads * head_dim), 0.02),
        "bo": init(ks[7], (dim,), 0.02),
    }
    x = jax.random.normal(ks[8], (bs, seqlen, dim), dtype=jnp.float32)

    out = attention_forward(x, params, n_heads, n_kv_heads)
    out = jax.block_until_ready(out)

    ref = attention_reference(x, params, n_heads, n_kv_heads)
    assert out.shape == (bs, seqlen, dim)
    assert jnp.allclose(out, ref, atol=1e-4, rtol=1e-4), "mismatch vs reference"

    print("KERNEL_OK")
</pallas_src>

<mosaic_0001>
module attributes {stable_mosaic.version = 11 : i64} {
  func.func @_linear_kernel(%arg0: i32, %arg1: i32, %arg2: i32, %arg3: memref<16x64xf32, #tpu.memory_space<vmem>>, %arg4: memref<64x128xf32, #tpu.memory_space<vmem>>, %arg5: memref<1x128xf32, #tpu.memory_space<vmem>>, %arg6: memref<16x128xf32, #tpu.memory_space<vmem>>, %arg7: memref<16x128xf32, #tpu.memory_space<vmem>>) attributes {dimension_semantics = [#tpu.dimension_semantics<parallel>, #tpu.dimension_semantics<parallel>, #tpu.dimension_semantics<arbitrary>], iteration_bounds = array<i64: 1, 1, 1>, scalar_prefetch = 0 : i64, scratch_operands = 1 : i64, tpu.core_type = #tpu.core_type<tc>, window_params = [{transform_indices = @transform_0, window_bounds = array<i64: 16, 64>}, {transform_indices = @transform_1, window_bounds = array<i64: 64, 128>}, {transform_indices = @transform_2, window_bounds = array<i64: 1, 128>}, {transform_indices = @transform_3, window_bounds = array<i64: 16, 128>}]} {
    %c0_i32 = arith.constant 0 : i32
    %0 = arith.cmpi eq, %arg2, %c0_i32 : i32
    %1 = arith.extui %0 : i1 to i32
    %c0_i32_0 = arith.constant 0 : i32
    %2 = arith.cmpi ne, %1, %c0_i32_0 : i32
    scf.if %2 {
      %cst_10 = arith.constant 0.000000e+00 : f32
      %12 = vector.broadcast %cst_10 : f32 to vector<16x128xf32>
      %c0_11 = arith.constant 0 : index
      %c0_12 = arith.constant 0 : index
      %13 = vector.load %arg7[%c0_11, %c0_12] : memref<16x128xf32, #tpu.memory_space<vmem>>, vector<16x128xf32>
      tpu.vector_store %arg7[%c0_11, %c0_12], %12 {strides = array<i32>} : memref<16x128xf32, #tpu.memory_space<vmem>>, vector<16x128xf32>,
    } else {
    }
    %c0 = arith.constant 0 : index
    %c0_1 = arith.constant 0 : index
    %3 = vector.load %arg7[%c0, %c0_1] : memref<16x128xf32, #tpu.memory_space<vmem>>, vector<16x128xf32>
    %c0_2 = arith.constant 0 : index
    %c0_3 = arith.constant 0 : index
    %4 = vector.load %arg3[%c0_2, %c0_3] : memref<16x64xf32, #tpu.memory_space<vmem>>, vector<16x64xf32>
    %c0_4 = arith.constant 0 : index
    %c0_5 = arith.constant 0 : index
    %5 = vector.load %arg4[%c0_4, %c0_5] : memref<64x128xf32, #tpu.memory_space<vmem>>, vector<64x128xf32>
    %cst = arith.constant dense<0.000000e+00> : vector<16x128xf32>
    %6 = tpu.matmul %4, %5, %cst {dimension_numbers = #tpu.dot_dimension_numbers<[1], [0], [0], [1], [0, 0, 1, 1], [], []>} : vector<16x64xf32>, vector<64x128xf32>, vector<16x128xf32> -> vector<16x128xf32>
    %7 = arith.addf %3, %6 : vector<16x128xf32>
    %c0_6 = arith.constant 0 : index
    %c0_7 = arith.constant 0 : index
    %8 = vector.load %arg7[%c0_6, %c0_7] : memref<16x128xf32, #tpu.memory_space<vmem>>, vector<16x128xf32>
    tpu.vector_store %arg7[%c0_6, %c0_7], %7 {strides = array<i32>} : memref<16x128xf32, #tpu.memory_space<vmem>>, vector<16x128xf32>,
    %c0_i32_8 = arith.constant 0 : i32
    %9 = arith.cmpi eq, %arg2, %c0_i32_8 : i32
    %10 = arith.extui %9 : i1 to i32
    %c0_i32_9 = arith.constant 0 : i32
    %11 = arith.cmpi ne, %10, %c0_i32_9 : i32
    scf.if %11 {
      %c0_10 = arith.constant 0 : index
      %c0_11 = arith.constant 0 : index
      %12 = vector.load %arg7[%c0_10, %c0_11] : memref<16x128xf32, #tpu.memory_space<vmem>>, vector<16x128xf32>
      %c0_12 = arith.constant 0 : index
      %c0_13 = arith.constant 0 : index
      %13 = vector.load %arg5[%c0_12, %c0_13] : memref<1x128xf32, #tpu.memory_space<vmem>>, vector<1x128xf32>
      %14 = vector.broadcast %13 : vector<1x128xf32> to vector<16x128xf32>
      %15 = arith.addf %12, %14 : vector<16x128xf32>
      %c0_14 = arith.constant 0 : index
      %c0_15 = arith.constant 0 : index
      %16 = vector.load %arg6[%c0_14, %c0_15] : memref<16x128xf32, #tpu.memory_space<vmem>>, vector<16x128xf32>
      tpu.vector_store %arg6[%c0_14, %c0_15], %15 {strides = array<i32>} : memref<16x128xf32, #tpu.memory_space<vmem>>, vector<16x128xf32>,
    } else {
    }
    return
  }
  func.func @transform_0(%arg0: i32, %arg1: i32, %arg2: i32) -> (i32, i32) {
    %c0_i32 = arith.constant 0 : i32
    return %arg0, %arg2 : i32, i32
  }
  func.func @transform_1(%arg0: i32, %arg1: i32, %arg2: i32) -> (i32, i32) {
    %c0_i32 = arith.constant 0 : i32
    return %arg2, %arg1 : i32, i32
  }
  func.func @transform_2(%arg0: i32, %arg1: i32, %arg2: i32) -> (i32, i32) {
    %c0_i32 = arith.constant 0 : i32
    %c0_i32_0 = arith.constant 0 : i32
    return %c0_i32, %arg1 : i32, i32
  }
  func.func @transform_3(%arg0: i32, %arg1: i32, %arg2: i32) -> (i32, i32) {
    %c0_i32 = arith.constant 0 : i32
    return %arg0, %arg1 : i32, i32
  }
}

</mosaic_0001>

<bundles_post_ra>
// kernel: tpu_custom_call.1
= control target key start
LH: loop header
LB: loop body
LE: loop exit
PB: predicated region body
PF: predicated region fallthrough
CT: control target
= control target key end

     0   :  { %8 = vsyncpa [#allocation4], 0  ;;  %s272_s0 = inlined_call_operand.hbm [shape: f32[16,64], index: 0, kind: input, shape index: {}]   ;;  %s273_s1 = inlined_call_operand.hbm [shape: f32[64,128], index: 1, kind: input, shape index: {}]   ;;  %s274_s2 = inlined_call_operand.vmem [shape: f32[1,128], index: 2, kind: input, shape index: {}]   ;;  %s275_s3 = inlined_call_operand.hbm [shape: f32[16,128], index: 3, kind: output, shape index: {}]  }
   0x1   :  { %9 = vsyncpa [#allocation7], 0 }
   0x2   :  { %10 = vsyncpa [#allocation5], 0  ;;  %s15_s14 = sshll.u32 %s272_s0, 4  ;;  %s226_s15 = smov [#allocation3]   ;;  %s16_s14 = int_to_ptr.hbm [resolvable:$true] %s15_s14 }
   0x3   :  { %s17_s16 = sshll.u32 %s226_s15, 4  ;;  %s28_s19 = sshll.u32 %s273_s1, 4  ;;  %s18_s16 = int_to_ptr.vmem [resolvable:$true] %s17_s16  ;;  %s29_s19 = int_to_ptr.hbm [resolvable:$true] %s28_s19 }
   0x4   :  { %s227_s20 = smov 128   ;;  %s228_s21 = smov 8  }
   0x5   :  { %23 = dma.hbm_to_vmem [thread:$0]  %s16_s14, 256, %s18_s16, [#allocation4], %s227_s20, %s227_s20, %s228_s21  }
   0x6   :  { %s229_s22 = smov [#allocation6]  }
   0x7   :  { %s30_s23 = sshll.u32 %s229_s22, 4  ;;  %s31_s23 = int_to_ptr.vmem [resolvable:$true] %s30_s23 }
   0x8   :  { %36 = dma.hbm_to_vmem [thread:$0]  %s29_s19, 1024, %s31_s23, [#allocation7], %s227_s20, %s227_s20, %s228_s21  }
   0x9   :  { %220 = dma.done.wait [#allocation4], 256  }
   0xa   :  { %221 = vsyncadd [#allocation4], 4294967040 }
   0xb   :  { %222 = dma.done.wait [#allocation7], 1024  }
   0xc   :  { %223 = vsyncadd [#allocation7], 4294966272  ;;  %v64_v0 = vld [vmem:[#allocation6 + $0x38] sm:$0xff]  ;;  %v63_v1 = vld [vmem:[#allocation6 + $0x30] sm:$0xff]  ;;  %vm65_vm0 = vcmask 523264   ;;  %s230_s24 = smov [#allocation8]  }
   0xd   :  { %80 = vmatpush.msra.mxu0 %v64_v0  ;;  %134 = vmatpush.msra.mxu1 %v64_v0  ;;  %v62_v2 = vld [vmem:[#allocation6 + $0x28] sm:$0xff]  ;;  %v61_v3 = vld [vmem:[#allocation6 + $0x20] sm:$0xff]  ;;  %v60_v4 = vld [vmem:[#allocation6 + $0x18] sm:$0xff]  ;;  %s116_s25 = sshll.u32 %s230_s24, 4  ;;  %s118_s28 = sshll.u32 %s275_s3, 4  ;;  %s117_s25 = int_to_ptr.vmem [resolvable:$true] %s116_s25  ;;  %s119_s28 = int_to_ptr.hbm [resolvable:$true] %s118_s28 }
   0xe   :  { %v59_v5 = vld [vmem:[#allocation6 + $0x10] sm:$0xff]  ;;  %v58_v6 = vld [vmem:[#allocation6 + $0x8] sm:$0xff]  ;;  %v57_v7 = vld [vmem:[#allocation6] sm:$0xff] }
   0xf   :  { %81 = vmatpush.msra.mxu0 %v63_v1  ;;  %135 = vmatpush.msra.mxu1 %v63_v1  ;;  %v55_v8 = vld [vmem:[#allocation3] sm:$0xff]  ;;  %v56_v9 = vld [vmem:[#allocation3 + $0x8] sm:$0xff] }
  0x10   :  { %v147_v10 = vld [vmem:[%s274_s2] ss:$0 sm:$0xff] }
  0x11   :  { %82 = vmatpush.msra.mxu0 %v62_v2  ;;  %136 = vmatpush.msra.mxu1 %v62_v2 }
  0x13   :  { %83 = vmatpush.msra.mxu0 %v61_v3  ;;  %137 = vmatpush.msra.mxu1 %v61_v3 }
  0x15   :  { %84 = vmatpush.msra.mxu0 %v60_v4  ;;  %138 = vmatpush.msra.mxu1 %v60_v4 }
  0x17   :  { %85 = vmatpush.msra.mxu0 %v59_v5  ;;  %139 = vmatpush.msra.mxu1 %v59_v5 }
  0x19   :  { %86 = vmatpush.msra.mxu0 %v58_v6  ;;  %140 = vmatpush.msra.mxu1 %v58_v6 }
  0x1b   :  { %87 = vmatpush.msra.mxu0 %v57_v7  ;;  %141 = vmatpush.msra.mxu1 %v57_v7 }
  0x1c   :  { %132 = vmatmul.msk.f32.vlgmr.msra.gmra.mxu0 %vm65_vm0, %v55_v8  ;;  %133 = vmatmul.msk.f32.vlgmr.msra.gmra.mxu1 %vm65_vm0, %v56_v9 }
  0x99   :  { %v89_v11 = vpop.f32.mrf.mxu0  ;;  %v92_v12 = vpop.f32.mrf.mxu1 }
  0x9a   :  { %v108_v13 = vadd.f32 %v147_v10, %v89_v11  ;;  %v109_v14 = vadd.f32 %v147_v10, %v92_v12 }
  0x9c   :  { %110 = vst [vmem:[#allocation8] sm:$0xff] %v108_v13 }
  0x9d   :  { %111 = vst [vmem:[#allocation8 + $0x8] sm:$0xff] %v109_v14 }
  0x9e   :  { %124 = dma.vmem_to_hbm [thread:$0]  %s117_s25, 256, %s119_s28, [#allocation5], %s227_s20, %s227_s20, %s228_s21  }
  0x9f   :  { %224 = dma.done.wait [#allocation5], 256  }
  0xa0   :  { %225 = vsyncadd [#allocation5], 4294967040 }
  0xa1   :  { %129 = vsyncpa [#allocation4], 1 }
  0xa2   :  { %130 = vsyncpa [#allocation7], 1 }
  0xa3   :  { %131 = vsyncpa [#allocation5], 1 }

</bundles_post_ra>
